<compile_context>
chip_gen: v6e
topology: v6e:2x2x1
jax: 0.10.0
libtpu: 0.0.40
codegen_flags: <defaults>
</compile_context>

<pallas_src>
import functools

import numpy as np
import jax
import jax.numpy as jnp
from jax.experimental import pallas as pl
from jax.experimental.pallas import tpu as pltpu

NEG_FILL = float(np.finfo(np.float16).min)  # matches torch.finfo(torch.float16).min
VMEM_LIMIT = 64 * 1024 * 1024               # within v7x's 64 MiB physical VMEM


def _pick_tile(dim, target, unit):
    """Largest tile <= target that divides dim and is a multiple of `unit`
    (falls back to the full dim, which is always a legal block)."""
    if dim <= target:
        return dim
    t = (target // unit) * unit
    while t >= unit:
        if dim % t == 0:
            return t
        t -= unit
    return dim


# ---------------------------------------------------------------------------
# Tiled matmul: grid (M/tm, N/tn, K/tk), f32 accumulator, K is the reduction.
# Optional fused residual add in the epilogue.
# ---------------------------------------------------------------------------

def _matmul_kernel(x_ref, w_ref, o_ref, acc_ref):
    @pl.when(pl.program_id(2) == 0)
    def _():
        acc_ref[...] = jnp.zeros_like(acc_ref)

    acc_ref[...] += jnp.dot(x_ref[...], w_ref[...],
                            preferred_element_type=jnp.float32)

    @pl.when(pl.program_id(2) == pl.num_programs(2) - 1)
    def _():
        o_ref[...] = acc_ref[...].astype(o_ref.dtype)


def _matmul_res_kernel(x_ref, w_ref, r_ref, o_ref, acc_ref):
    @pl.when(pl.program_id(2) == 0)
    def _():
        acc_ref[...] = jnp.zeros_like(acc_ref)

    acc_ref[...] += jnp.dot(x_ref[...], w_ref[...],
                            preferred_element_type=jnp.float32)

    @pl.when(pl.program_id(2) == pl.num_programs(2) - 1)
    def _():
        o_ref[...] = (r_ref[...] + acc_ref[...]).astype(o_ref.dtype)


def pallas_matmul(x, w, residual=None, *, out_dtype=jnp.float32,
                  tm=256, tn=256, tk=512):
    M, K = x.shape
    _, N = w.shape
    tm = _pick_tile(M, tm, 8)
    tn = _pick_tile(N, tn, 128)
    tk = _pick_tile(K, tk, 128)
    x_spec = pl.BlockSpec((tm, tk), lambda i, j, k: (i, k))
    w_spec = pl.BlockSpec((tk, tn), lambda i, j, k: (k, j))
    o_spec = pl.BlockSpec((tm, tn), lambda i, j, k: (i, j))
    if residual is None:
        kernel = _matmul_kernel
        in_specs = [x_spec, w_spec]
        args = (x, w)
    else:
        kernel = _matmul_res_kernel
        in_specs = [x_spec, w_spec, pl.BlockSpec((tm, tn), lambda i, j, k: (i, j))]
        args = (x, w, residual)
    return pl.pallas_call(
        kernel,
        out_shape=jax.ShapeDtypeStruct((M, N), out_dtype),
        grid_spec=pltpu.PrefetchScalarGridSpec(
            num_scalar_prefetch=0,
            grid=(M // tm, N // tn, K // tk),
            in_specs=in_specs,
            out_specs=o_spec,
            scratch_shapes=[pltpu.VMEM((tm, tn), jnp.float32)],
        ),
        compiler_params=pltpu.CompilerParams(
            dimension_semantics=("parallel", "parallel", "arbitrary"),
            vmem_limit_bytes=VMEM_LIMIT),
    )(*args)


# ---------------------------------------------------------------------------
# RMSNorm, gridded over rows. Output dtype is parameterized so layer norms
# that only feed matmuls can be stored as bf16.
# ---------------------------------------------------------------------------

def _rmsnorm_kernel(x_ref, w_ref, o_ref, *, eps):
    x = x_ref[...].astype(jnp.float32)
    var = jnp.mean(x * x, axis=-1, keepdims=True)
    o_ref[...] = (w_ref[...] * (x * jax.lax.rsqrt(var + eps))).astype(o_ref.dtype)


def pallas_rmsnorm(x, w, eps, *, out_dtype=jnp.float32, tm=256):
    M, H = x.shape
    tm = _pick_tile(M, tm, 8)
    return pl.pallas_call(
        functools.partial(_rmsnorm_kernel, eps=eps),
        out_shape=jax.ShapeDtypeStruct((M, H), out_dtype),
        grid_spec=pltpu.PrefetchScalarGridSpec(
            num_scalar_prefetch=0,
            grid=(M // tm,),
            in_specs=[
                pl.BlockSpec((tm, H), lambda i: (i, 0)),
                pl.BlockSpec((1, H), lambda i: (0, 0)),
            ],
            out_specs=pl.BlockSpec((tm, H), lambda i: (i, 0)),
        ),
        compiler_params=pltpu.CompilerParams(
            dimension_semantics=("parallel",),
            vmem_limit_bytes=VMEM_LIMIT),
    )(x, w.reshape(1, H))


# ---------------------------------------------------------------------------
# Fused MLP: (silu(x@wg) * (x@wu)) @ wd + residual, tiled over (M, I) with the
# intermediate axis I as the trailing reduction (accumulator) axis.
# wgu is bf16 [2, H, I] (gate = wgu[0], up = wgu[1]); x is bf16; acc is f32.
# ---------------------------------------------------------------------------

def _mlp_kernel(x_ref, wgu_ref, wd_ref, r_ref, o_ref, acc_ref):
    i_idx = pl.program_id(1)

    @pl.when(i_idx == 0)
    def _():
        acc_ref[...] = jnp.zeros_like(acc_ref)

    x = x_ref[...]
    wgu = wgu_ref[...]
    g = jnp.dot(x, wgu[0], preferred_element_type=jnp.float32)
    u = jnp.dot(x, wgu[1], preferred_element_type=jnp.float32)
    h = g * jax.nn.sigmoid(g) * u
    acc_ref[...] += jnp.dot(h.astype(jnp.bfloat16), wd_ref[...],
                            preferred_element_type=jnp.float32)

    @pl.when(i_idx == pl.num_programs(1) - 1)
    def _():
        o_ref[...] = (r_ref[...] + acc_ref[...]).astype(o_ref.dtype)


def pallas_mlp(x, wgu, wd, residual, *, tm=256, ti=256):
    M, H = x.shape
    I = wgu.shape[2]
    tm = _pick_tile(M, tm, 8)
    ti = _pick_tile(I, ti, 128)
    return pl.pallas_call(
        _mlp_kernel,
        out_shape=jax.ShapeDtypeStruct((M, H), jnp.float32),
        grid_spec=pltpu.PrefetchScalarGridSpec(
            num_scalar_prefetch=0,
            grid=(M // tm, I // ti),
            in_specs=[
                pl.BlockSpec((tm, H), lambda m, i: (m, 0)),
                pl.BlockSpec((2, H, ti), lambda m, i: (0, 0, i)),
                pl.BlockSpec((ti, H), lambda m, i: (i, 0)),
                pl.BlockSpec((tm, H), lambda m, i: (m, 0)),
            ],
            out_specs=pl.BlockSpec((tm, H), lambda m, i: (m, 0)),
            scratch_shapes=[pltpu.VMEM((tm, H), jnp.float32)],
        ),
        compiler_params=pltpu.CompilerParams(
            dimension_semantics=("parallel", "arbitrary"),
            vmem_limit_bytes=VMEM_LIMIT),
    )(x, wgu, wd, residual)


# ---------------------------------------------------------------------------
# Flash-style attention: grid (B, KVH, T/tk) — all rep = NH/KVH query heads
# sharing a kv-head are processed per step, so each K/V tile is read once.
# Bias (padding [B, T] + in-kernel causal iota) is built on the fly; online
# softmax in f32; matmul operands in bf16.
# ---------------------------------------------------------------------------

def _attn_kernel(q_ref, k_ref, v_ref, pad_ref, o_ref, m_sc, l_sc, acc_sc,
                 *, scale_inv, t_minus_s, rep, s_len, tkk, causal):
    b = pl.program_id(0)
    kv = pl.program_id(2)

    @pl.when(kv == 0)
    def _():
        m_sc[...] = jnp.full_like(m_sc, -jnp.inf)
        l_sc[...] = jnp.zeros_like(l_sc)
        acc_sc[...] = jnp.zeros_like(acc_sc)

    d = q_ref.shape[-1]
    # (1, rep, S, D) -> (rep*S, D): leading-dim collapse (requires S % 8 == 0
    # or S small enough to be a single sublane tile; demo uses S = 8).
    q = q_ref[...].reshape(rep * s_len, d).astype(jnp.bfloat16)
    k = k_ref[...][0, 0].astype(jnp.bfloat16)     # (tkk, D)
    v = v_ref[...][0, 0].astype(jnp.bfloat16)     # (tkk, D)

    # q @ k^T via dot_general (no XLU transpose), f32 accumulation.
    s = jax.lax.dot_general(q, k, (((1,), (1,)), ((), ())),
                            preferred_element_type=jnp.float32)
    s = s * scale_inv

    # Additive bias built in-kernel — no [B, S, T] tensor ever hits HBM.
    bias = pad_ref[pl.ds(b, 1), :]                # (1, tkk) padding bias
    if causal:
        qpos = jax.lax.broadcasted_iota(
            jnp.int32, (rep, s_len, tkk), 1).reshape(rep * s_len, tkk)
        col = jax.lax.broadcasted_iota(
            jnp.int32, (rep * s_len, tkk), 1) + kv * tkk
        bias = bias + jnp.where(col > qpos + t_minus_s, NEG_FILL, 0.0)
    s = s + bias

    m_prev = m_sc[...]
    m_new = jnp.maximum(m_prev, jnp.max(s, axis=-1, keepdims=True))
    alpha = jnp.exp(m_prev - m_new)
    p = jnp.exp(s - m_new)
    l_sc[...] = alpha * l_sc[...] + jnp.sum(p, axis=-1, keepdims=True)
    acc_sc[...] = alpha * acc_sc[...] + jnp.dot(
        p.astype(jnp.bfloat16), v, preferred_element_type=jnp.float32)
    m_sc[...] = m_new

    @pl.when(kv == pl.num_programs(2) - 1)
    def _():
        out = acc_sc[...] * pl.reciprocal(l_sc[...], approx=False)
        o_ref[...] = out.astype(o_ref.dtype).reshape(o_ref.shape)


def pallas_flash_attention(q, k, v, pad_bias, scale, *, causal=True, tk=512):
    # q: [B, NH, S, D] f32, k/v: [B, KVH, T, D] f32, pad_bias: [B, T] f32.
    B, NH, S, D = q.shape
    KVH, T = k.shape[1], k.shape[2]
    rep = NH // KVH
    tkk = _pick_tile(T, tk, 128)
    kernel = functools.partial(
        _attn_kernel, scale_inv=1.0 / float(scale), t_minus_s=T - S,
        rep=rep, s_len=S, tkk=tkk, causal=causal)
    return pl.pallas_call(
        kernel,
        out_shape=jax.ShapeDtypeStruct((B, NH, S, D), jnp.bfloat16),
        grid_spec=pltpu.PrefetchScalarGridSpec(
            num_scalar_prefetch=0,
            grid=(B, KVH, T // tkk),
            in_specs=[
                pl.BlockSpec((1, rep, S, D), lambda b, g, kv: (b, g, 0, 0)),
                pl.BlockSpec((1, 1, tkk, D), lambda b, g, kv: (b, g, kv, 0)),
                pl.BlockSpec((1, 1, tkk, D), lambda b, g, kv: (b, g, kv, 0)),
                pl.BlockSpec((B, tkk), lambda b, g, kv: (0, kv)),
            ],
            out_specs=pl.BlockSpec((1, rep, S, D), lambda b, g, kv: (b, g, 0, 0)),
            scratch_shapes=[
                pltpu.VMEM((rep * S, 1), jnp.float32),   # running max
                pltpu.VMEM((rep * S, 1), jnp.float32),   # running denom
                pltpu.VMEM((rep * S, D), jnp.float32),   # running numerator
            ],
        ),
        compiler_params=pltpu.CompilerParams(
            dimension_semantics=("parallel", "parallel", "arbitrary"),
            vmem_limit_bytes=VMEM_LIMIT),
    )(q, k, v, pad_bias)


# ---------------------------------------------------------------------------
# Output projection: reads the attention output per-(b, head-group) tile,
# reduces over head groups in-kernel (wo stored as [NH, D, H], bf16), fuses
# the residual add, and groups G heads per grid step to amortize per-step
# overhead and attention-tile re-reads.
# ---------------------------------------------------------------------------

def _oproj_kernel(a_ref, w_ref, r_ref, o_ref, acc_ref, *, group):
    hg = pl.program_id(2)

    @pl.when(hg == 0)
    def _():
        acc_ref[...] = jnp.zeros_like(acc_ref)

    a = a_ref[...]                        # (1, G, S, D) bf16
    w = w_ref[...]                        # (G, D, tn)  bf16
    part = jnp.dot(a[0, 0], w[0], preferred_element_type=jnp.float32)
    for g in range(1, group):             # static unroll over grouped heads
        part = part + jnp.dot(a[0, g], w[g], preferred_element_type=jnp.float32)
    acc_ref[...] += part

    @pl.when(hg == pl.num_programs(2) - 1)
    def _():
        o_ref[...] = (r_ref[...][0] + acc_ref[...]).astype(o_ref.dtype)[None]


def pallas_out_proj(attn, wo_heads, residual, *, tn=256, group=4):
    # attn: [B, NH, S, D] bf16, wo_heads: [NH, D, H] bf16, residual: [B, S, H] f32
    B, NH, S, D = attn.shape
    H = wo_heads.shape[2]
    tnn = _pick_tile(H, tn, 128)
    g = min(group, NH)
    while NH % g != 0:
        g -= 1
    kernel = functools.partial(_oproj_kernel, group=g)
    return pl.pallas_call(
        kernel,
        out_shape=jax.ShapeDtypeStruct((B, S, H), jnp.float32),
        grid_spec=pltpu.PrefetchScalarGridSpec(
            num_scalar_prefetch=0,
            grid=(B, H // tnn, NH // g),
            in_specs=[
                pl.BlockSpec((1, g, S, D), lambda b, n, hg: (b, hg, 0, 0)),
                pl.BlockSpec((g, D, tnn), lambda b, n, hg: (hg, 0, n)),
                pl.BlockSpec((1, S, tnn), lambda b, n, hg: (b, 0, n)),
            ],
            out_specs=pl.BlockSpec((1, S, tnn), lambda b, n, hg: (b, 0, n)),
            scratch_shapes=[pltpu.VMEM((S, tnn), jnp.float32)],
        ),
        compiler_params=pltpu.CompilerParams(
            dimension_semantics=("parallel", "parallel", "arbitrary"),
            vmem_limit_bytes=VMEM_LIMIT),
    )(attn, wo_heads, residual)


# ------------------------------ JAX glue ------------------------------

def rotary_mat(hidden_size, num_heads, max_seq_len, theta=10000.0, head_scale=1.0):
    head_dim = head_scale * hidden_size / num_heads
    pos = jnp.arange(0, head_dim, 2, dtype=jnp.float32)
    freqs = 1.0 / theta ** (pos / head_dim)
    idx = jnp.arange(max_seq_len, dtype=jnp.float32)
    freqs = jnp.outer(idx, freqs)
    freqs = jnp.concatenate([freqs, freqs], axis=-1)
    return jnp.cos(freqs), jnp.sin(freqs)


def rotate_half(x):
    half = x.shape[-1] // 2
    return jnp.concatenate([-x[..., half:], x[..., :half]], axis=-1)


def apply_rope(x, cos, sin, position_ids):
    d = x.shape[-1]
    c = cos[:, :d][position_ids][:, None, :, :]   # [B,1,S,D]
    s = sin[:, :d][position_ids][:, None, :, :]
    return x * c + rotate_half(x) * s


def broadcast_key_value(h, n_rep):
    B, KVH, T, D = h.shape
    return jnp.broadcast_to(h[:, :, None, :, :], (B, KVH, n_rep, T, D)).reshape(
        B, KVH * n_rep, T, D)


def build_padding_bias(attention_mask):
    # [B, T] additive padding bias (0 where attended, NEG_FILL where masked).
    inv = 1.0 - attention_mask.astype(jnp.float32)
    return jnp.where(inv != 0.0, NEG_FILL, inv)


def build_additive_mask(use_cache, attention_mask, seq_len):
    # Reference-only: per-batch additive mask [B, S, T].
    B, T = attention_mask.shape
    expanded = jnp.broadcast_to(
        attention_mask[:, None, :].astype(jnp.float32), (B, seq_len, T))
    inv = 1.0 - expanded
    mask_score = jnp.where(inv != 0.0, NEG_FILL, inv)
    if not use_cache:
        causal = jnp.tril(jnp.ones((B, seq_len, T), jnp.float32), k=T - seq_len)
        inv_c = 1.0 - causal
        mask_score = mask_score + jnp.where(inv_c != 0.0, NEG_FILL, inv_c)
    return mask_score


# --------------------------- Pallas model path ---------------------------

def make_fused_params(params, cfg, hidden_size):
    NH = cfg['num_heads']
    D = hidden_size // NH
    fused_layers = []
    for lp in params['layers']:
        a, m = lp['attn'], lp['mlp']
        fused_layers.append(dict(
            input_ln=lp['input_ln'],
            wqkv=jnp.concatenate([a['wq'], a['wk'], a['wv']],
                                 axis=1).astype(jnp.bfloat16),
            wo_heads=a['wo'].reshape(NH, D, hidden_size).astype(jnp.bfloat16),
            wgu=jnp.stack([m['wg'], m['wu']], axis=0).astype(jnp.bfloat16),
            wd=m['wd'].astype(jnp.bfloat16),
        ))
    return dict(layers=fused_layers, norm_w=params['norm_w'],
                cos=params['cos'], sin=params['sin'])


def self_attention_pallas(fp, x_norm_flat, x_resid, position_ids, attention_mask,
                          cos, sin, k_cache, v_cache, use_cache, cfg):
    B, S, H = x_resid.shape
    NH, KVH = cfg['num_heads'], cfg['num_kv_heads']
    D = H // NH
    KVW = KVH * D

    # fused QKV projection (bf16 MXU operands, f32 output for cache fidelity).
    qkv = pallas_matmul(x_norm_flat, fp['wqkv'])            # [M, H + 2*KVW] f32
    q = qkv[:, :H].reshape(B, S, NH, D).transpose(0, 2, 1, 3)
    k = qkv[:, H:H + KVW].reshape(B, S, KVH, D).transpose(0, 2, 1, 3)
    v = qkv[:, H + KVW:].reshape(B, S, KVH, D).transpose(0, 2, 1, 3)

    # TODO(synk): fuse RoPE + head-split transposes into the QKV matmul epilogue.
    q = apply_rope(q, cos, sin, position_ids)
    k = apply_rope(k, cos, sin, position_ids)

    k_cache = jnp.concatenate([k_cache, k], axis=2)
    v_cache = jnp.concatenate([v_cache, v], axis=2)

    # padding bias only; causal part is generated inside the attention kernel.
    pad_bias = build_padding_bias(attention_mask)             # [B, T]
    attn = pallas_flash_attention(q, k_cache, v_cache, pad_bias, cfg['scale'],
                                  causal=not use_cache)
    # output projection + residual add fused in one kernel.
    out = pallas_out_proj(attn, fp['wo_heads'], x_resid)
    return out, k_cache, v_cache


def transformer_layer_pallas(fp, x, position_ids, attention_mask, k_cache, v_cache,
                             cos, sin, use_cache, cfg):
    B, S, H = x.shape
    xf = x.reshape(B * S, H)
    # layer norm output feeds only matmuls -> bf16 halves its HBM traffic.
    attn_norm = pallas_rmsnorm(xf, fp['input_ln'], cfg['eps'],
                               out_dtype=jnp.bfloat16)        # [M, H] bf16
    h, k_out, v_out = self_attention_pallas(
        fp, attn_norm, x, position_ids, attention_mask, cos, sin,
        k_cache, v_cache, use_cache, cfg)
    # apply_residual_connection_post_layernorm=False: MLP consumes attn_norm,
    # residual (h) fused into the MLP epilogue.
    out = pallas_mlp(attn_norm, fp['wgu'], fp['wd'], h.reshape(B * S, H))
    return out.reshape(B, S, H), k_out, v_out


def model_forward_pallas(fused_params, use_cache, embeddings, position_ids,
                         attention_mask, cache, cfg):
    x = embeddings   # use_embeddings=True -> embeddings passed directly
    cos, sin = fused_params['cos'], fused_params['sin']
    k_caches, v_caches = [], []
    for li, fp in enumerate(fused_params['layers']):
        x, kc, vc = transformer_layer_pallas(
            fp, x, position_ids, attention_mask,
            cache[li]['key'], cache[li]['value'], cos, sin, use_cache, cfg)
        k_caches.append(kc)
        v_caches.append(vc)
    B, S, H = x.shape
    out = pallas_rmsnorm(x.reshape(B * S, H), fused_params['norm_w'],
                         cfg['eps'], out_dtype=jnp.float32).reshape(B, S, H)
    return out, k_caches, v_caches


# ---------------------- pure-JAX reference (mirrors torch) ----------------------

def ref_forward(params, use_cache, embeddings, position_ids, attention_mask, cache, cfg):
    NH, KVH, eps, scale = (cfg['num_heads'], cfg['num_kv_heads'],
                           cfg['eps'], cfg['scale'])
    cos, sin = params['cos'], params['sin']
    x = embeddings
    B, S, H = x.shape
    D = H // NH

    def rms(v, w):
        var = jnp.mean(v * v, axis=-1, keepdims=True)
        return w * (v * jax.lax.rsqrt(var + eps))

    k_caches, v_caches = [], []
    for li, lp in enumerate(params['layers']):
        a, m = lp['attn'], lp['mlp']
        xn = rms(x, lp['input_ln'])
        q = (xn @ a['wq']).reshape(B, S, NH, D).transpose(0, 2, 1, 3)
        k = (xn @ a['wk']).reshape(B, S, KVH, D).transpose(0, 2, 1, 3)
        v = (xn @ a['wv']).reshape(B, S, KVH, D).transpose(0, 2, 1, 3)
        q = apply_rope(q, cos, sin, position_ids)
        k = apply_rope(k, cos, sin, position_ids)
        k_cache = jnp.concatenate([cache[li]['key'], k], axis=2)
        v_cache = jnp.concatenate([cache[li]['value'], v], axis=2)
        key, val = k_cache, v_cache
        if NH != KVH:
            key = broadcast_key_value(key, NH // KVH)
            val = broadcast_key_value(val, NH // KVH)
        score = jnp.einsum('bhsd,bhtd->bhst', q, key) / scale
        mask = build_additive_mask(use_cache, attention_mask, S)
        score = score + mask[:, None, :, :]
        prob = jax.nn.softmax(score, axis=-1)
        attn = jnp.einsum('bhst,bhtd->bhsd', prob, val)
        attn = attn.transpose(0, 2, 1, 3).reshape(B, S, H)
        h = x + attn @ a['wo']
        g = xn @ m['wg']
        x = h + (g * jax.nn.sigmoid(g) * (xn @ m['wu'])) @ m['wd']
        k_caches.append(k_cache)
        v_caches.append(v_cache)
    return rms(x, params['norm_w']), k_caches, v_caches


# --------------------------------- main ---------------------------------

if __name__ == "__main__":
    B, S, H = 2, 8, 32
    NH, KVH = 4, 2
    D = H // NH
    I = 64
    n_layers = 2
    max_pos = 16
    eps = 1e-5
    cfg = dict(num_heads=NH, num_kv_heads=KVH, eps=eps, scale=float(np.sqrt(D)))

    key = jax.random.PRNGKey(0)
    keys = jax.random.split(key, 8 * n_layers + 2)
    ki = iter(keys)

    def nrm(k, shape):
        return 0.02 * jax.random.normal(k, shape, jnp.float32)

    layers = []
    for _ in range(n_layers):
        layers.append(dict(
            input_ln=jnp.ones((H,), jnp.float32),
            attn=dict(
                wq=nrm(next(ki), (H, H)),
                wk=nrm(next(ki), (H, KVH * D)),
                wv=nrm(next(ki), (H, KVH * D)),
                wo=nrm(next(ki), (H, H)),
            ),
            mlp=dict(
                wg=nrm(next(ki), (H, I)),
                wu=nrm(next(ki), (H, I)),
                wd=nrm(next(ki), (I, H)),
            ),
        ))
    cos, sin = rotary_mat(H, NH, max_pos, head_scale=1.0)
    params = dict(layers=layers, norm_w=jnp.ones((H,), jnp.float32), cos=cos, sin=sin)
    fused_params = make_fused_params(params, cfg, H)

    embeddings = jax.random.normal(next(ki), (B, S, H), jnp.float32)
    position_ids = jnp.broadcast_to(jnp.arange(S, dtype=jnp.int32), (B, S))
    attention_mask = jnp.ones((B, S), jnp.int32)
    cache = [dict(key=jnp.zeros((B, KVH, 0, D), jnp.float32),
                  value=jnp.zeros((B, KVH, 0, D), jnp.float32))
             for _ in range(n_layers)]

    out, k_caches, v_caches = model_forward_pallas(
        fused_params, False, embeddings, position_ids, attention_mask, cache, cfg)
    jax.block_until_ready(out)

    # pure-JAX f32 reference check (tolerance accounts for the bf16 MXU
    # operands; exact EUP reciprocal is used in the softmax epilogue).
    ref_out, ref_k, ref_v = ref_forward(
        params, False, embeddings, position_ids, attention_mask, cache, cfg)
    np.testing.assert_allclose(np.asarray(out), np.asarray(ref_out),
                               rtol=1e-2, atol=1e-2)
    for a, b in zip(k_caches, ref_k):
        np.testing.assert_allclose(np.asarray(a), np.asarray(b), rtol=1e-2, atol=3e-3)
    for a, b in zip(v_caches, ref_v):
        np.testing.assert_allclose(np.asarray(a), np.asarray(b), rtol=1e-2, atol=3e-3)

    print("KERNEL_OK")
</pallas_src>

<mosaic_0001>
module attributes {stable_mosaic.version = 11 : i64} {
  func.func @_rmsnorm_kernel(%arg0: i32, %arg1: memref<16x32xf32, #tpu.memory_space<vmem>>, %arg2: memref<1x32xf32, #tpu.memory_space<vmem>>, %arg3: memref<16x32xbf16, #tpu.memory_space<vmem>>) attributes {dimension_semantics = [#tpu.dimension_semantics<parallel>], iteration_bounds = array<i64: 1>, scalar_prefetch = 0 : i64, scratch_operands = 0 : i64, tpu.core_type = #tpu.core_type<tc>, window_params = [{transform_indices = @transform_0, window_bounds = array<i64: 16, 32>}, {pipeline_mode = #tpu.pipeline_mode<synchronous>, transform_indices = @transform_1, window_bounds = array<i64: 1, 32>}, {transform_indices = @transform_2, window_bounds = array<i64: 16, 32>}]} {
    %c0 = arith.constant 0 : index
    %c0_0 = arith.constant 0 : index
    %0 = vector.load %arg1[%c0, %c0_0] : memref<16x32xf32, #tpu.memory_space<vmem>>, vector<16x32xf32>
    %1 = arith.mulf %0, %0 : vector<16x32xf32>
    %cst = arith.constant dense<0.000000e+00> : vector<16xf32>
    %2 = vector.multi_reduction <add>, %1, %cst [1] : vector<16x32xf32> to vector<16xf32>
    %3 = vector.shape_cast %2 : vector<16xf32> to vector<16x1xf32>
    %cst_1 = arith.constant 3.200000e+01 : f32
    %4 = vector.broadcast %cst_1 : f32 to vector<16x1xf32>
    %5 = arith.divf %3, %4 : vector<16x1xf32>
    %c0_2 = arith.constant 0 : index
    %c0_3 = arith.constant 0 : index
    %6 = vector.load %arg2[%c0_2, %c0_3] : memref<1x32xf32, #tpu.memory_space<vmem>>, vector<1x32xf32>
    %cst_4 = arith.constant 9.99999974E-6 : f32
    %7 = vector.broadcast %cst_4 : f32 to vector<16x1xf32>
    %8 = arith.addf %5, %7 : vector<16x1xf32>
    %9 = math.rsqrt %8 : vector<16x1xf32>
    %10 = vector.broadcast %9 : vector<16x1xf32> to vector<16x32xf32>
    %11 = arith.mulf %0, %10 : vector<16x32xf32>
    %12 = vector.broadcast %6 : vector<1x32xf32> to vector<16x32xf32>
    %13 = arith.mulf %12, %11 : vector<16x32xf32>
    %14 = arith.truncf %13 : vector<16x32xf32> to vector<16x32xbf16>
    %c0_5 = arith.constant 0 : index
    %c0_6 = arith.constant 0 : index
    %15 = vector.load %arg3[%c0_5, %c0_6] : memref<16x32xbf16, #tpu.memory_space<vmem>>, vector<16x32xbf16>
    tpu.vector_store %arg3[%c0_5, %c0_6], %14 {strides = array<i32>} : memref<16x32xbf16, #tpu.memory_space<vmem>>, vector<16x32xbf16>,
    return
  }
  func.func @transform_0(%arg0: i32) -> (i32, i32) {
    %c0_i32 = arith.constant 0 : i32
    %c0_i32_0 = arith.constant 0 : i32
    return %arg0, %c0_i32 : i32, i32
  }
  func.func @transform_1(%arg0: i32) -> (i32, i32) {
    %c0_i32 = arith.constant 0 : i32
    %c0_i32_0 = arith.constant 0 : i32
    %c0_i32_1 = arith.constant 0 : i32
    return %c0_i32, %c0_i32_0 : i32, i32
  }
  func.func @transform_2(%arg0: i32) -> (i32, i32) {
    %c0_i32 = arith.constant 0 : i32
    %c0_i32_0 = arith.constant 0 : i32
    return %arg0, %c0_i32 : i32, i32
  }
}

</mosaic_0001>

<bundles_post_ra>
// kernel: tpu_custom_call.1
= control target key start
LH: loop header
LB: loop body
LE: loop exit
PB: predicated region body
PF: predicated region fallthrough
CT: control target
= control target key end

     0   :  { %7 = vsyncpa [#allocation3], 0  ;;  %s172_s0 = inlined_call_operand.hbm [shape: f32[16,32], index: 0, kind: input, shape index: {}]   ;;  %s173_s1 = inlined_call_operand.vmem [shape: f32[1,32], index: 1, kind: input, shape index: {}]   ;;  %s174_s2 = inlined_call_operand.hbm [shape: bf16[16,32], index: 2, kind: output, shape index: {}]  }
   0x1   :  { %8 = vsyncpa [#allocation4], 0  ;;  %s142_s9 = smov [#allocation2]  }
   0x2   :  { %s14_s10 = sshll.u32 %s142_s9, 4  ;;  %s15_s10 = int_to_ptr.vmem [resolvable:$true] %s14_s10 }
   0x3   :  { %s106_s11 = scalar_lea.vmem %s15_s10, 256  ;;  %p111_p1 = scmp.lt.s32.totalorder %s15_s10, %s15_s10 }
   0x4   :  { %p107_p0 = scmp.ne.s32.totalorder %s15_s10, %s106_s11  ;;  %p112_p2 = scmp.lt.s32.totalorder %s106_s11, %s106_s11 }
   0x6   :  { %p113_p3 = por %p112_p2, %p111_p1 }
   0x8   :  { %p114_p4 = pnand %p113_p3, %p107_p0 }
   0xa   :  { %117 = shalt.err (!%p114_p4)
}
   0xb   :  { %s143_s12 = smov 128   ;;  %s144_s13 = smov 8  }
   0xc   :  { %20 = dma.hbm_to_vmem [thread:$0]  %s172_s0, 256, %s15_s10, [#allocation3], %s143_s12, %s143_s12, %s144_s13  }
   0xd   :  { %138 = dma.done.wait [#allocation3], 256  }
   0xe   :  { %139 = vsyncadd [#allocation3], 4294967040  ;;  %v26_v0 = vld [vmem:[#allocation2] sm:$0xff]  ;;  %vm30_vm0 = vcmask 261120   ;;  %v27_v1 = vld [vmem:[#allocation2 + $0x8] sm:$0xff]  ;;  %vm63_vm1 = vcmask 257024  }
   0xf   :  { %v28_v2 = vmul.f32 %v26_v0, %v26_v0  ;;  %v29_v3 = vmul.f32 %v27_v1, %v27_v1  ;;  %v83_v13 = vld [vmem:[%s173_s1] ss:$0 sm:$0xff]  ;;  %s145_s17 = smov [#allocation5]  }
  0x10   :  { %s71_s18 = sshll.u32 %s145_s17, 4  ;;  %s72_s18 = int_to_ptr.vmem [resolvable:$true] %s71_s18 }
  0x11   :  { %v31_v4 = vsel %vm30_vm0, %v28_v2, 0.0  ;;  %v34_v5 = vsel %vm30_vm0, %v29_v3, 0.0  ;;  %s118_s19 = scalar_lea.vmem %s72_s18, 128  ;;  %p123_p6 = scmp.lt.s32.totalorder %s72_s18, %s72_s18 }
  0x12   :  { %32 = vadd.xlane.f32.xlu0 %v31_v4  ;;  %p119_p5 = scmp.ne.s32.totalorder %s72_s18, %s118_s19  ;;  %p124_p7 = scmp.lt.s32.totalorder %s118_s19, %s118_s19 }
  0x14   :  { %p125_p8 = por %p124_p7, %p123_p6 }
  0x16   :  { %35 = vadd.xlane.f32.xlu0 %v34_v5  ;;  %p126_p9 = pnand %p125_p8, %p119_p5 }
  0x9b   :  { %v33_v6 = vpop.xlane.xlu0 %32 }
  0x9c   :  { %v38_v7 = vmul.f32 0.03125, %v33_v6 }
  0x9e   :  { %v41_v8 = vadd.f32 1e-05, %v38_v7 }
  0x9f   :  { %v36_v9 = vpop.xlane.xlu0 %35 }
  0xa0   :  { %94 = vrsqrt.f32 %v41_v8  ;;  %v39_v10 = vmul.f32 0.03125, %v36_v9 }
  0xa2   :  { %v42_v11 = vadd.f32 1e-05, %v39_v10 }
  0xa4   :  { %96 = vrsqrt.f32 %v42_v11 }
  0xad   :  { %v95_v12 = vpop.eup %94 }
  0xae   :  { %v45_v14 = vmul.f32 %v95_v12, %v26_v0 }
  0xb0   :  { %v53_v15 = vmul.f32 %v83_v13, %v45_v14 }
  0xb1   :  { %v97_v16 = vpop.eup %96 }
  0xb2   :  { %v46_v17 = vmul.f32 %v97_v16, %v27_v1  ;;  %v86_v18 = vpack.c.bf16 %v53_v15, %v53_v15 }
  0xb4   :  { %v54_v19 = vmul.f32 %v83_v13, %v46_v17  ;;  %64 = vst.msk [vmem:[#allocation5] sm:$0xf] %vm63_vm1, %v86_v18 }
  0xb6   :  { %v87_v20 = vpack.c.bf16 %v54_v19, %v54_v19 }
  0xb8   :  { %65 = vst.msk [vmem:[#allocation5 + $0x4] sm:$0xf] %vm63_vm1, %v87_v20 }
  0xb9   :  { %129 = shalt.err (!%p126_p9)
}
  0xba   :  { %s146_s1 = smov 64   ;;  %s147_s20 = smov 4  }
  0xbb   :  { %77 = dma.vmem_to_hbm [thread:$0]  %s72_s18, 128, %s174_s2, [#allocation4], %s146_s1, %s146_s1, %s147_s20  }
  0xbc   :  { %140 = dma.done.wait [#allocation4], 128  }
  0xbd   :  { %141 = vsyncadd [#allocation4], 4294967168 }
  0xbe   :  { %81 = vsyncpa [#allocation3], 1 }
  0xbf   :  { %82 = vsyncpa [#allocation4], 1 }

</bundles_post_ra>
